<compile_context>
chip_gen: v6e
topology: v6e:2x2x1
jax: 0.10.0
libtpu: 0.0.40
codegen_flags: <defaults>
</compile_context>

<pallas_src>
import functools

import numpy as np
import jax
import jax.numpy as jnp
from jax import lax
from jax.experimental import pallas as pl
from jax.experimental.pallas import tpu as pltpu

EPS = 1e-5
ACT_DTYPE = jnp.bfloat16           # inter-kernel activations / MXU operands
VMEM_LIMIT = 32 * 1024 * 1024      # safe on v5e / v6e / v7x


# --------------------------------------------------------------------------- helpers
def _sigmoid(x):
    return 1.0 / (1.0 + jnp.exp(-x))


def _gn_scale_shift(s, ss, gmask, gmask_t, count):
    """Per-channel (mean, inv_std) for GroupNorm from per-channel sums.

    s, ss : (1, C) sums / sums-of-squares over the valid spatial positions.
    gmask : (G, C) 0/1 group membership, gmask_t its transpose.  Group reductions
    and the broadcast back to channels are two tiny matmuls.
    """
    gsum = jnp.dot(s, gmask_t, preferred_element_type=jnp.float32)       # (1, G)
    gss = jnp.dot(ss, gmask_t, preferred_element_type=jnp.float32)       # (1, G)
    mean_g = gsum / count
    var_g = jnp.maximum(gss / count - mean_g * mean_g, 0.0)              # clamp
    inv_g = lax.rsqrt(var_g + EPS)
    mean_c = jnp.dot(mean_g, gmask, preferred_element_type=jnp.float32)  # (1, C)
    inv_c = jnp.dot(inv_g, gmask, preferred_element_type=jnp.float32)    # (1, C)
    return mean_c, inv_c


# --------------------------------------------------------------------------- stem kernel
def stem_kernel(x_ref, w_ref, g_ref, b_ref, gmask_ref, gmask_t_ref, o_ref, *, gw):
    x = x_ref[0]                                                      # (M, K) bf16
    y = jnp.dot(x, w_ref[...], preferred_element_type=jnp.float32)    # (M, C) f32
    s = jnp.sum(y, axis=0, keepdims=True)
    q = jnp.sum(y * y, axis=0, keepdims=True)
    mean_c, inv_c = _gn_scale_shift(s, q, gmask_ref[...], gmask_t_ref[...],
                                    float(y.shape[0] * gw))
    out = jnp.maximum((y - mean_c) * inv_c * g_ref[...] + b_ref[...], 0.0)
    o_ref[0] = out.astype(o_ref.dtype)


def stem_forward(x_flat, st):
    N, M, K = x_flat.shape
    C = st['w'].shape[1]
    groups = st['groups']
    gw = C // groups
    kern = functools.partial(stem_kernel, gw=gw)
    return pl.pallas_call(
        kern,
        out_shape=jax.ShapeDtypeStruct((N, M, C), ACT_DTYPE),
        grid=(N,),
        in_specs=[
            pl.BlockSpec((1, M, K), lambda n: (n, 0, 0)),
            pl.BlockSpec((K, C), lambda n: (0, 0)),
            pl.BlockSpec((1, C), lambda n: (0, 0)),
            pl.BlockSpec((1, C), lambda n: (0, 0)),
            pl.BlockSpec((groups, C), lambda n: (0, 0)),
            pl.BlockSpec((C, groups), lambda n: (0, 0)),
        ],
        out_specs=pl.BlockSpec((1, M, C), lambda n: (n, 0, 0)),
        compiler_params=pltpu.CompilerParams(
            dimension_semantics=("parallel",),
            vmem_limit_bytes=VMEM_LIMIT),
    )(x_flat, st['w'], st['gamma'], st['beta'], st['gmask'], st['gmask_t'])


# --------------------------------------------------------------------------- fused RegNet block kernel
def regnet_block_kernel(
        x_ref,                                   # (1, Mp, Cin) bf16, flat zero-padded input
        mask_ref,                                # (Mp, 1) f32 interior mask
        sel_ref,                                 # (M2, Ma) bf16 0/1 anchor selection
        w1_ref, g1_ref, b1_ref,                  # 1x1 conv + GN
        w2_ref, g2_ref, b2_ref,                  # block-diag grouped 3x3 (9C, C) + GN
        w3_ref, g3_ref, b3_ref,                  # 1x1 conv + GN
        wds_ref, gds_ref, bds_ref,               # downsample 1x1 + GN (dummy if unused)
        wse1_ref, bse1_ref, wse2_ref, bse2_ref,  # SE MLP (bf16 weights, f32 biases)
        gmask_ref, gmask_t_ref,                  # (G, C), (C, G)
        o_ref,                                   # (1, M2, C) bf16
        *, H, W, stride, gw, has_ds, use_se):
    f32 = jnp.float32
    Wp = W + 2
    Ma = H * Wp - 2            # contiguous "anchor" rows (valid ones picked by sel)
    m1 = H * W                 # interior positions (GN1 count)
    gmask = gmask_ref[...]
    gmask_t = gmask_t_ref[...]
    sel = sel_ref[...]
    m2 = sel.shape[0]

    xf = x_ref[0]                                                      # (Mp, Cin) bf16

    # ---- conv1 (1x1) over the padded field: ONE matmul.  Halo rows produce exact
    # zeros, so GN sums over all rows equal the interior sums (count uses H*W only).
    y1 = jnp.dot(xf, w1_ref[...], preferred_element_type=f32)          # (Mp, C) f32
    s1 = jnp.sum(y1, axis=0, keepdims=True)
    q1 = jnp.sum(y1 * y1, axis=0, keepdims=True)
    mean1, inv1 = _gn_scale_shift(s1, q1, gmask, gmask_t, float(m1 * gw))
    h1 = jnp.maximum((y1 - mean1) * inv1 * g1_ref[...] + b1_ref[...], 0.0)
    h1 = (h1 * mask_ref[...]).astype(ACT_DTYPE)                        # re-zero halo

    # ---- grouped 3x3 conv as ONE block-diagonal matmul.  The 9 taps are
    # contiguous row-slices of the flat padded map (offset ky*Wp + kx), concatenated
    # lane-wise into (Ma, 9C); the 0/1 selection matmul picks the strided / valid
    # anchors exactly (bf16 pass-through), then (M2, 9C) @ (9C, C).
    taps = []
    for t in range(9):
        ky, kx = divmod(t, 3)
        off = ky * Wp + kx
        taps.append(h1[off:off + Ma, :])                               # (Ma, C) bf16
    patch = jnp.concatenate(taps, axis=1)                              # (Ma, 9C) bf16
    patch = jnp.dot(sel, patch, preferred_element_type=f32).astype(ACT_DTYPE)
    y2 = jnp.dot(patch, w2_ref[...], preferred_element_type=f32)       # (M2, C) f32
    s2 = jnp.sum(y2, axis=0, keepdims=True)
    q2 = jnp.sum(y2 * y2, axis=0, keepdims=True)
    mean2, inv2 = _gn_scale_shift(s2, q2, gmask, gmask_t, float(m2 * gw))
    h2 = jnp.maximum((y2 - mean2) * inv2 * g2_ref[...] + b2_ref[...], 0.0)

    # ---- conv3 (1x1) + GN
    y3 = jnp.dot(h2.astype(ACT_DTYPE), w3_ref[...], preferred_element_type=f32)
    s3 = jnp.sum(y3, axis=0, keepdims=True)
    q3 = jnp.sum(y3 * y3, axis=0, keepdims=True)
    mean3, inv3 = _gn_scale_shift(s3, q3, gmask, gmask_t, float(m2 * gw))
    h3 = (y3 - mean3) * inv3 * g3_ref[...] + b3_ref[...]

    # ---- skip path: identity, or [AvgPool(3,2,1)] + 1x1 conv + GN ---------------
    center = xf[Wp + 1:Wp + 1 + Ma, :]                                 # interior taps
    if has_ds:
        if stride == 2:
            # AvgPool2d(3, 2, 1) (count_include_pad=True): 3x3 box sum of the padded
            # input at all anchors, then the same selection matmul, then /9.
            box = xf[0:Ma, :].astype(f32)
            for t in range(1, 9):
                ky, kx = divmod(t, 3)
                box = box + xf[ky * Wp + kx:ky * Wp + kx + Ma, :].astype(f32)
            pooled = jnp.dot(sel, box.astype(ACT_DTYPE),
                             preferred_element_type=f32) * (1.0 / 9.0)
            row_in = pooled.astype(ACT_DTYPE)                          # (M2, Cin)
        else:
            row_in = jnp.dot(sel, center, preferred_element_type=f32).astype(ACT_DTYPE)
        yd = jnp.dot(row_in, wds_ref[...], preferred_element_type=f32)  # (M2, C)
        sd = jnp.sum(yd, axis=0, keepdims=True)
        qd = jnp.sum(yd * yd, axis=0, keepdims=True)
        meand, invd = _gn_scale_shift(sd, qd, gmask, gmask_t, float(m2 * gw))
        skip = (yd - meand) * invd * gds_ref[...] + bds_ref[...]
    else:
        # identity skip: exact 0/1 selection of the input rows, no scratch copy.
        skip = jnp.dot(sel, center, preferred_element_type=f32)        # (M2, C)

    # ---- SE + residual combine --------------------------------------------------
    if use_se:
        pooled = jnp.sum(h3, axis=0, keepdims=True) * (1.0 / m2)       # (1, C)
        e = jnp.maximum(
            jnp.dot(pooled.astype(ACT_DTYPE), wse1_ref[...],
                    preferred_element_type=f32) + bse1_ref[...], 0.0)
        e = _sigmoid(jnp.dot(e.astype(ACT_DTYPE), wse2_ref[...],
                             preferred_element_type=f32) + bse2_ref[...])
        out = jnp.maximum(h3 * e + skip, 0.0)
    else:
        out = jnp.maximum(h3 + skip, 0.0)
    o_ref[0] = out.astype(o_ref.dtype)


def regnet_block_forward(x_nhwc, b, use_se):
    N, H, W, cin = x_nhwc.shape
    cout = b['cout']
    stride = b['stride']
    groups = b['groups']
    gw = cout // groups
    cr = b['cr']
    Ho = (H - 1) // stride + 1
    Wo = (W - 1) // stride + 1
    m2 = Ho * Wo
    Wp = W + 2
    Mp = (H + 2) * Wp
    Ma = H * Wp - 2

    # One cheap XLA pad + flatten per block; the padded tile lives in VMEM in-kernel.
    x_pad = jnp.pad(x_nhwc.astype(ACT_DTYPE), ((0, 0), (1, 1), (1, 1), (0, 0)))
    x_flat = x_pad.reshape(N, Mp, cin)

    # Interior mask over the flat padded layout.
    ii = np.arange(Mp)
    ri, ci = ii // Wp, ii % Wp
    interior = ((ri >= 1) & (ri <= H) & (ci >= 1) & (ci <= W)).astype(np.float32)
    mask = jnp.asarray(interior[:, None])                              # (Mp, 1) f32

    # Anchor-selection matrix: output (r, c) <- flat anchor (stride*r)*Wp + stride*c.
    sel_np = np.zeros((m2, Ma), np.float32)
    for r in range(Ho):
        for c in range(Wo):
            sel_np[r * Wo + c, stride * r * Wp + stride * c] = 1.0
    sel = jnp.asarray(sel_np, ACT_DTYPE)

    kern = functools.partial(
        regnet_block_kernel,
        H=H, W=W, stride=stride, gw=gw, has_ds=b['has_ds'], use_se=use_se)

    def fs(shape):
        return pl.BlockSpec(shape, lambda n: (0,) * len(shape))

    out = pl.pallas_call(
        kern,
        out_shape=jax.ShapeDtypeStruct((N, m2, cout), ACT_DTYPE),
        grid=(N,),
        in_specs=[
            pl.BlockSpec((1, Mp, cin), lambda n: (n, 0, 0)),
            fs((Mp, 1)), fs((m2, Ma)),
            fs((cin, cout)), fs((1, cout)), fs((1, cout)),
            fs((9 * cout, cout)), fs((1, cout)), fs((1, cout)),
            fs((cout, cout)), fs((1, cout)), fs((1, cout)),
            fs((cin, cout)), fs((1, cout)), fs((1, cout)),
            fs((cout, cr)), fs((1, cr)), fs((cr, cout)), fs((1, cout)),
            fs((groups, cout)), fs((cout, groups)),
        ],
        out_specs=pl.BlockSpec((1, m2, cout), lambda n: (n, 0, 0)),
        compiler_params=pltpu.CompilerParams(
            dimension_semantics=("parallel",),
            vmem_limit_bytes=VMEM_LIMIT),
    )(x_flat, mask, sel,
      b['w1'], b['gn1_gamma'], b['gn1_beta'],
      b['w2bd'], b['gn2_gamma'], b['gn2_beta'],
      b['wc3'], b['gn3_gamma'], b['gn3_beta'],
      b['ds_w'], b['ds_gamma'], b['ds_beta'],
      b['se_w1'], b['se_b1'], b['se_w2'], b['se_b2'],
      b['gmask'], b['gmask_t'])
    return out.reshape(N, Ho, Wo, cout)


# --------------------------------------------------------------------------- glue
def space_to_depth_nchw(x):
    N, C, H, W = x.shape
    x = x.reshape(N, C, H // 2, 2, W // 2, 2)
    x = jnp.transpose(x, (0, 3, 5, 1, 2, 4))
    return x.reshape(N, C * 4, H // 2, W // 2)


def make_gmask(groups, channels):
    gw = channels // groups
    return (jnp.arange(channels)[None, :] // gw
            == jnp.arange(groups)[:, None]).astype(jnp.float32)


def block_diag_w3(w, groups):
    """Torch grouped conv weight (C, C//G, 3, 3) -> block-diagonal (9*C, C)."""
    c_out = w.shape[0]
    gw = c_out // groups
    w_t = jnp.transpose(w.reshape(groups, gw, gw, 3, 3), (3, 4, 0, 2, 1))  # ky,kx,g,ci,co
    w_t = w_t.reshape(9, groups, gw, gw)
    out = jnp.zeros((9, c_out, c_out), jnp.float32)
    for g in range(groups):
        out = out.at[:, g * gw:(g + 1) * gw, g * gw:(g + 1) * gw].set(w_t[:, g])
    return out.reshape(9 * c_out, c_out)


# --------------------------------------------------------------------------- params
def init_params(key, in_channels, initial_channels, stage_widths, stage_depths,
                stage_group_widths):
    keys = iter(jax.random.split(key, 1024))

    def nrm(shape, scale=0.1):
        return scale * jax.random.normal(next(keys), shape, jnp.float32)

    def gn(c):
        return (1.0 + 0.1 * jax.random.normal(next(keys), (c,), jnp.float32),
                0.1 * jax.random.normal(next(keys), (c,), jnp.float32))

    params = {}
    sg, sb = gn(initial_channels)
    params['stem'] = dict(
        w=nrm((initial_channels, in_channels * 4, 1, 1)),
        gamma=sg, beta=sb,
        groups=initial_channels // stage_group_widths[0])

    blocks = []
    cur = initial_channels
    for si in range(len(stage_depths)):
        width = stage_widths[si]
        gw = stage_group_widths[si]
        groups = width // gw
        for bi in range(stage_depths[si]):
            stride = 2 if bi == 0 else 1
            b = dict(stride=stride, groups=groups)
            if stride != 1 or cur != width:
                b['ds_w'] = nrm((width, cur, 1, 1))
                b['ds_gamma'], b['ds_beta'] = gn(width)
            b['conv1_w'] = nrm((width, cur, 1, 1))
            b['gn1_gamma'], b['gn1_beta'] = gn(width)
            b['conv2_w'] = nrm((width, width // groups, 3, 3))
            b['gn2_gamma'], b['gn2_beta'] = gn(width)
            b['conv3_w'] = nrm((width, width, 1, 1))
            b['gn3_gamma'], b['gn3_beta'] = gn(width)
            cr = int(width / 4)          # SE with r=4
            b['se_w1'] = nrm((cr, width))
            b['se_b1'] = nrm((cr,))
            b['se_w2'] = nrm((width, cr))
            b['se_b2'] = nrm((width,))
            blocks.append(b)
            cur = width
    params['blocks'] = blocks
    return params


def prepare_pallas_params(params):
    stem = params['stem']
    c0, k0 = stem['w'].shape[0], stem['w'].shape[1]
    g0 = stem['groups']
    gm0 = make_gmask(g0, c0)
    pp = {'stem': dict(
        w=jnp.asarray(stem['w'].reshape(c0, k0).T, ACT_DTYPE),
        gamma=stem['gamma'][None, :].astype(jnp.float32),
        beta=stem['beta'][None, :].astype(jnp.float32),
        groups=g0, gmask=gm0, gmask_t=jnp.transpose(gm0))}

    blocks = []
    for b in params['blocks']:
        cout, cin = b['conv1_w'].shape[0], b['conv1_w'].shape[1]
        groups = b['groups']
        cr = b['se_w1'].shape[0]
        has_ds = 'ds_w' in b
        gm = make_gmask(groups, cout)
        nb = dict(
            stride=b['stride'], groups=groups, cin=cin, cout=cout, cr=cr,
            has_ds=has_ds, gmask=gm, gmask_t=jnp.transpose(gm),
            w1=jnp.asarray(b['conv1_w'].reshape(cout, cin).T, ACT_DTYPE),
            gn1_gamma=b['gn1_gamma'][None, :].astype(jnp.float32),
            gn1_beta=b['gn1_beta'][None, :].astype(jnp.float32),
            w2bd=block_diag_w3(b['conv2_w'], groups).astype(ACT_DTYPE),
            gn2_gamma=b['gn2_gamma'][None, :].astype(jnp.float32),
            gn2_beta=b['gn2_beta'][None, :].astype(jnp.float32),
            wc3=jnp.asarray(b['conv3_w'].reshape(cout, cout).T, ACT_DTYPE),
            gn3_gamma=b['gn3_gamma'][None, :].astype(jnp.float32),
            gn3_beta=b['gn3_beta'][None, :].astype(jnp.float32),
            se_w1=jnp.asarray(b['se_w1'].T, ACT_DTYPE),
            se_b1=b['se_b1'][None, :].astype(jnp.float32),
            se_w2=jnp.asarray(b['se_w2'].T, ACT_DTYPE),
            se_b2=b['se_b2'][None, :].astype(jnp.float32))
        if has_ds:
            nb['ds_w'] = jnp.asarray(b['ds_w'].reshape(cout, cin).T, ACT_DTYPE)
            nb['ds_gamma'] = b['ds_gamma'][None, :].astype(jnp.float32)
            nb['ds_beta'] = b['ds_beta'][None, :].astype(jnp.float32)
        else:
            nb['ds_w'] = jnp.zeros((cin, cout), ACT_DTYPE)
            nb['ds_gamma'] = jnp.ones((1, cout), jnp.float32)
            nb['ds_beta'] = jnp.zeros((1, cout), jnp.float32)
        blocks.append(nb)
    pp['blocks'] = blocks
    return pp


# --------------------------------------------------------------------------- pallas forward
def pallas_forward(x_nchw, pparams, use_se):
    x = space_to_depth_nchw(x_nchw)
    x = jnp.transpose(x, (0, 2, 3, 1))                    # NHWC
    N, H, W, K = x.shape
    st = pparams['stem']
    C0 = st['w'].shape[1]
    h = stem_forward(x.reshape(N, H * W, K).astype(ACT_DTYPE), st)
    h = h.reshape(N, H, W, C0)
    for b in pparams['blocks']:
        h = regnet_block_forward(h, b, use_se)
    return jnp.transpose(h, (0, 3, 1, 2)).astype(jnp.float32)


# --------------------------------------------------------------------------- pure-JAX reference
def ref_conv1x1(x, w):
    return jax.lax.conv_general_dilated(
        x, w, (1, 1), 'VALID', dimension_numbers=('NCHW', 'OIHW', 'NCHW'))


def ref_conv3x3(x, w, stride, groups):
    return jax.lax.conv_general_dilated(
        x, w, (stride, stride), ((1, 1), (1, 1)),
        dimension_numbers=('NCHW', 'OIHW', 'NCHW'), feature_group_count=groups)


def ref_gn(x, gamma, beta, groups):
    N, C, H, W = x.shape
    xg = x.reshape(N, groups, -1)
    mean = xg.mean(axis=2, keepdims=True)
    var = xg.var(axis=2, keepdims=True)
    xn = ((xg - mean) / jnp.sqrt(var + EPS)).reshape(N, C, H, W)
    return xn * gamma[None, :, None, None] + beta[None, :, None, None]


def ref_avgpool(x):
    xp = jnp.pad(x, ((0, 0), (0, 0), (1, 1), (1, 1)))
    s = jax.lax.reduce_window(xp, 0.0, jax.lax.add, (1, 1, 3, 3), (1, 1, 2, 2), 'VALID')
    return s / 9.0


def ref_block(x, b, use_se):
    stride, groups = b['stride'], b['groups']
    cin, cout = x.shape[1], b['conv1_w'].shape[0]
    if stride != 1 or cin != cout:
        skip = x
        if stride != 1:
            skip = ref_avgpool(skip)
        skip = ref_gn(ref_conv1x1(skip, b['ds_w']), b['ds_gamma'], b['ds_beta'], groups)
    else:
        skip = x
    h = jnp.maximum(ref_gn(ref_conv1x1(x, b['conv1_w']), b['gn1_gamma'], b['gn1_beta'], groups), 0.)
    h = jnp.maximum(ref_gn(ref_conv3x3(h, b['conv2_w'], stride, groups),
                           b['gn2_gamma'], b['gn2_beta'], groups), 0.)
    h = ref_gn(ref_conv1x1(h, b['conv3_w']), b['gn3_gamma'], b['gn3_beta'], groups)
    if use_se:
        pooled = h.mean(axis=(2, 3))                                   # (N, C)
        e = jnp.maximum(pooled @ b['se_w1'].T + b['se_b1'], 0.)
        e = jax.nn.sigmoid(e @ b['se_w2'].T + b['se_b2'])
        h = h * e[:, :, None, None]
    return jnp.maximum(h + skip, 0.)


def ref_forward(x_nchw, params, use_se):
    x = space_to_depth_nchw(x_nchw)
    stem = params['stem']
    h = jnp.maximum(ref_gn(ref_conv1x1(x, stem['w']), stem['gamma'], stem['beta'],
                           stem['groups']), 0.)
    for b in params['blocks']:
        h = ref_block(h, b, use_se)
    return h


# --------------------------------------------------------------------------- main
if __name__ == "__main__":
    key = jax.random.PRNGKey(0)
    kx, kp = jax.random.split(key)

    # RegNet(in_channels=3, initial_channels=8, stage_widths=[16, 32],
    #        stage_depths=[2, 2], stage_group_widths=[8, 8], use_se=True/False)
    x = jax.random.normal(kx, (2, 3, 16, 16), jnp.float32)
    params = init_params(kp, in_channels=3, initial_channels=8,
                         stage_widths=(16, 32), stage_depths=(2, 2),
                         stage_group_widths=(8, 8))
    pparams = prepare_pallas_params(params)

    for use_se in (True, False):      # RegNetY blocks / RegNetX blocks
        out = jax.block_until_ready(pallas_forward(x, pparams, use_se))
        ref = jax.block_until_ready(ref_forward(x, params, use_se))
        assert out.shape == (2, 32, 2, 2), out.shape
        # bf16 activations / weights vs. a pure-f32 reference -> loose tolerance.
        np.testing.assert_allclose(np.asarray(out), np.asarray(ref),
                                   rtol=1e-1, atol=1e-1)

    print("KERNEL_OK")
</pallas_src>

<mosaic_0001>
module attributes {stable_mosaic.version = 11 : i64} {
  func.func @stem_kernel(%arg0: i32, %arg1: memref<1x64x12xbf16, #tpu.memory_space<vmem>>, %arg2: memref<12x8xbf16, #tpu.memory_space<vmem>>, %arg3: memref<1x8xf32, #tpu.memory_space<vmem>>, %arg4: memref<1x8xf32, #tpu.memory_space<vmem>>, %arg5: memref<1x8xf32, #tpu.memory_space<vmem>>, %arg6: memref<8x1xf32, #tpu.memory_space<vmem>>, %arg7: memref<1x64x8xbf16, #tpu.memory_space<vmem>>) attributes {dimension_semantics = [#tpu.dimension_semantics<parallel>], iteration_bounds = array<i64: 2>, scalar_prefetch = 0 : i64, scratch_operands = 0 : i64, tpu.core_type = #tpu.core_type<tc>, window_params = [{transform_indices = @transform_0, window_bounds = array<i64: 1, 64, 12>}, {pipeline_mode = #tpu.pipeline_mode<synchronous>, transform_indices = @transform_1, window_bounds = array<i64: 12, 8>}, {pipeline_mode = #tpu.pipeline_mode<synchronous>, transform_indices = @transform_2, window_bounds = array<i64: 1, 8>}, {pipeline_mode = #tpu.pipeline_mode<synchronous>, transform_indices = @transform_3, window_bounds = array<i64: 1, 8>}, {pipeline_mode = #tpu.pipeline_mode<synchronous>, transform_indices = @transform_4, window_bounds = array<i64: 1, 8>}, {pipeline_mode = #tpu.pipeline_mode<synchronous>, transform_indices = @transform_5, window_bounds = array<i64: 8, 1>}, {transform_indices = @transform_6, window_bounds = array<i64: 1, 64, 8>}]} {
    %c0 = arith.constant 0 : index
    %c0_0 = arith.constant 0 : index
    %c0_1 = arith.constant 0 : index
    %0 = vector.load %arg1[%c0, %c0_0, %c0_1] : memref<1x64x12xbf16, #tpu.memory_space<vmem>>, vector<1x64x12xbf16>
    %1 = vector.shape_cast %0 : vector<1x64x12xbf16> to vector<64x12xbf16>
    %c0_2 = arith.constant 0 : index
    %c0_3 = arith.constant 0 : index
    %2 = vector.load %arg2[%c0_2, %c0_3] : memref<12x8xbf16, #tpu.memory_space<vmem>>, vector<12x8xbf16>
    %cst = arith.constant dense<0.000000e+00> : vector<64x8xf32>
    %3 = tpu.matmul %1, %2, %cst {dimension_numbers = #tpu.dot_dimension_numbers<[1], [0], [0], [1], [0, 0, 1, 1], [], []>} : vector<64x12xbf16>, vector<12x8xbf16>, vector<64x8xf32> -> vector<64x8xf32>
    %cst_4 = arith.constant dense<0.000000e+00> : vector<8xf32>
    %4 = vector.multi_reduction <add>, %3, %cst_4 [0] : vector<64x8xf32> to vector<8xf32>
    %5 = vector.shape_cast %4 : vector<8xf32> to vector<1x8xf32>
    %6 = arith.mulf %3, %3 : vector<64x8xf32>
    %cst_5 = arith.constant dense<0.000000e+00> : vector<8xf32>
    %7 = vector.multi_reduction <add>, %6, %cst_5 [0] : vector<64x8xf32> to vector<8xf32>
    %8 = vector.shape_cast %7 : vector<8xf32> to vector<1x8xf32>
    %c0_6 = arith.constant 0 : index
    %c0_7 = arith.constant 0 : index
    %9 = vector.load %arg5[%c0_6, %c0_7] : memref<1x8xf32, #tpu.memory_space<vmem>>, vector<1x8xf32>
    %c0_8 = arith.constant 0 : index
    %c0_9 = arith.constant 0 : index
    %10 = vector.load %arg6[%c0_8, %c0_9] : memref<8x1xf32, #tpu.memory_space<vmem>>, vector<8x1xf32>
    %cst_10 = arith.constant dense<0.000000e+00> : vector<1x1xf32>
    %11 = tpu.matmul %5, %10, %cst_10 {dimension_numbers = #tpu.dot_dimension_numbers<[1], [0], [0], [1], [0, 0, 1, 1], [], []>} : vector<1x8xf32>, vector<8x1xf32>, vector<1x1xf32> -> vector<1x1xf32>
    %cst_11 = arith.constant dense<0.000000e+00> : vector<1x1xf32>
    %12 = tpu.matmul %8, %10, %cst_11 {dimension_numbers = #tpu.dot_dimension_numbers<[1], [0], [0], [1], [0, 0, 1, 1], [], []>} : vector<1x8xf32>, vector<8x1xf32>, vector<1x1xf32> -> vector<1x1xf32>
    %cst_12 = arith.constant 5.120000e+02 : f32
    %13 = vector.broadcast %cst_12 : f32 to vector<1x1xf32>
    %14 = arith.divf %11, %13 : vector<1x1xf32>
    %cst_13 = arith.constant 5.120000e+02 : f32
    %15 = vector.broadcast %cst_13 : f32 to vector<1x1xf32>
    %16 = arith.divf %12, %15 : vector<1x1xf32>
    %17 = arith.mulf %14, %14 : vector<1x1xf32>
    %18 = arith.subf %16, %17 : vector<1x1xf32>
    %cst_14 = arith.constant 0.000000e+00 : f32
    %19 = vector.broadcast %cst_14 : f32 to vector<1x1xf32>
    %20 = arith.maximumf %18, %19 : vector<1x1xf32>
    %cst_15 = arith.constant 9.99999974E-6 : f32
    %21 = vector.broadcast %cst_15 : f32 to vector<1x1xf32>
    %22 = arith.addf %20, %21 : vector<1x1xf32>
    %23 = math.rsqrt %22 : vector<1x1xf32>
    %cst_16 = arith.constant dense<0.000000e+00> : vector<1x8xf32>
    %24 = tpu.matmul %14, %9, %cst_16 {dimension_numbers = #tpu.dot_dimension_numbers<[1], [0], [0], [1], [0, 0, 1, 1], [], []>} : vector<1x1xf32>, vector<1x8xf32>, vector<1x8xf32> -> vector<1x8xf32>
    %cst_17 = arith.constant dense<0.000000e+00> : vector<1x8xf32>
    %25 = tpu.matmul %23, %9, %cst_17 {dimension_numbers = #tpu.dot_dimension_numbers<[1], [0], [0], [1], [0, 0, 1, 1], [], []>} : vector<1x1xf32>, vector<1x8xf32>, vector<1x8xf32> -> vector<1x8xf32>
    %26 = vector.broadcast %24 : vector<1x8xf32> to vector<64x8xf32>
    %27 = arith.subf %3, %26 : vector<64x8xf32>
    %28 = vector.broadcast %25 : vector<1x8xf32> to vector<64x8xf32>
    %29 = arith.mulf %27, %28 : vector<64x8xf32>
    %c0_18 = arith.constant 0 : index
    %c0_19 = arith.constant 0 : index
    %30 = vector.load %arg3[%c0_18, %c0_19] : memref<1x8xf32, #tpu.memory_space<vmem>>, vector<1x8xf32>
    %31 = vector.broadcast %30 : vector<1x8xf32> to vector<64x8xf32>
    %32 = arith.mulf %29, %31 : vector<64x8xf32>
    %c0_20 = arith.constant 0 : index
    %c0_21 = arith.constant 0 : index
    %33 = vector.load %arg4[%c0_20, %c0_21] : memref<1x8xf32, #tpu.memory_space<vmem>>, vector<1x8xf32>
    %34 = vector.broadcast %33 : vector<1x8xf32> to vector<64x8xf32>
    %35 = arith.addf %32, %34 : vector<64x8xf32>
    %cst_22 = arith.constant 0.000000e+00 : f32
    %36 = vector.broadcast %cst_22 : f32 to vector<64x8xf32>
    %37 = arith.maximumf %35, %36 : vector<64x8xf32>
    %38 = arith.truncf %37 : vector<64x8xf32> to vector<64x8xbf16>
    %c0_23 = arith.constant 0 : index
    %c0_24 = arith.constant 0 : index
    %c0_25 = arith.constant 0 : index
    %39 = vector.load %arg7[%c0_23, %c0_24, %c0_25] : memref<1x64x8xbf16, #tpu.memory_space<vmem>>, vector<1x64x8xbf16>
    %40 = vector.shape_cast %39 : vector<1x64x8xbf16> to vector<64x8xbf16>
    %41 = vector.shape_cast %38 : vector<64x8xbf16> to vector<1x64x8xbf16>
    tpu.vector_store %arg7[%c0_23, %c0_24, %c0_25], %41 {strides = array<i32>} : memref<1x64x8xbf16, #tpu.memory_space<vmem>>, vector<1x64x8xbf16>,
    return
  }
  func.func @transform_0(%arg0: i32) -> (i32, i32, i32) {
    %c0_i32 = arith.constant 0 : i32
    %c0_i32_0 = arith.constant 0 : i32
    %c0_i32_1 = arith.constant 0 : i32
    return %arg0, %c0_i32, %c0_i32_0 : i32, i32, i32
  }
  func.func @transform_1(%arg0: i32) -> (i32, i32) {
    %c0_i32 = arith.constant 0 : i32
    %c0_i32_0 = arith.constant 0 : i32
    %c0_i32_1 = arith.constant 0 : i32
    return %c0_i32, %c0_i32_0 : i32, i32
  }
  func.func @transform_2(%arg0: i32) -> (i32, i32) {
    %c0_i32 = arith.constant 0 : i32
    %c0_i32_0 = arith.constant 0 : i32
    %c0_i32_1 = arith.constant 0 : i32
    return %c0_i32, %c0_i32_0 : i32, i32
  }
  func.func @transform_3(%arg0: i32) -> (i32, i32) {
    %c0_i32 = arith.constant 0 : i32
    %c0_i32_0 = arith.constant 0 : i32
    %c0_i32_1 = arith.constant 0 : i32
    return %c0_i32, %c0_i32_0 : i32, i32
  }
  func.func @transform_4(%arg0: i32) -> (i32, i32) {
    %c0_i32 = arith.constant 0 : i32
    %c0_i32_0 = arith.constant 0 : i32
    %c0_i32_1 = arith.constant 0 : i32
    return %c0_i32, %c0_i32_0 : i32, i32
  }
  func.func @transform_5(%arg0: i32) -> (i32, i32) {
    %c0_i32 = arith.constant 0 : i32
    %c0_i32_0 = arith.constant 0 : i32
    %c0_i32_1 = arith.constant 0 : i32
    return %c0_i32, %c0_i32_0 : i32, i32
  }
  func.func @transform_6(%arg0: i32) -> (i32, i32, i32) {
    %c0_i32 = arith.constant 0 : i32
    %c0_i32_0 = arith.constant 0 : i32
    %c0_i32_1 = arith.constant 0 : i32
    return %arg0, %c0_i32, %c0_i32_0 : i32, i32, i32
  }
}

</mosaic_0001>

<bundles_post_ra>
// kernel: tpu_custom_call.1
= control target key start
LH: loop header
LB: loop body
LE: loop exit
PB: predicated region body
PF: predicated region fallthrough
CT: control target
= control target key end

     0   :  { %s1038_s21 = smov 0   ;;  %s1167_s0 = inlined_call_operand.vmem [shape: bf16[2,64,12], index: 0, kind: input, shape index: {}]   ;;  %s1168_s1 = inlined_call_operand.vmem [shape: bf16[12,8], index: 1, kind: input, shape index: {}]   ;;  %s1169_s2 = inlined_call_operand.vmem [shape: f32[1,8], index: 2, kind: input, shape index: {}]   ;;  %s1170_s3 = inlined_call_operand.vmem [shape: f32[1,8], index: 3, kind: input, shape index: {}]   ;;  %s1171_s4 = inlined_call_operand.vmem [shape: f32[1,8], index: 4, kind: input, shape index: {}]   ;;  %s1172_s5 = inlined_call_operand.vmem [shape: f32[8,1], index: 5, kind: input, shape index: {}]   ;;  %s1173_s6 = inlined_call_operand.vmem [shape: bf16[2,64,8], index: 6, kind: output, shape index: {}]  }
   0x1 LB: > { %s886_s22 = sadd.s32 4294967295, %s999_s21   ;;  %p890_p0 = scmp.ge.s32.totalorder %s999_s21, 1  ;;  %s999_s21 = sphi %s1038_s21, %s16_s21  }
   0x2   : > { %p212_p1 = scmp.lt.s32.totalorder %s999_s21, 3 }
   0x4   : > { %p213_p2 = pnand %p890_p0, %p212_p1 }
   0x5   : > { %p242_p3 = scmp.lt.s32.totalorder (!%p213_p2), %s886_s22, 1 }
   0x6   : > { %216 = sbr.rel (%p213_p2) target bundleno = 670 (0x29e), region = 44 }
   0xb   : > { %v986_v0 = vld [vmem:[%s1168_s1] sm:$0x3f]   ;;  %vm301_vm0 = vcmask 1045504   ;;  %s1175_s22 = smov (!%p242_p3, %s886_s22), 1  ;;  %vm288_vm1 = vcmask 97280   ;;  %v1001_v7 = vmov 0.0  }
   0xc   : > { %975 = vmatprep.subr.msk.bf16.mxu0 %vm301_vm0, %v986_v0  ;;  %v303_v1 = vsel %vm301_vm0, %v986_v0, 0  ;;  %s922_s25 = sshll.u32 %s1175_s22, 5  ;;  %v1060_v6 = vld [vmem:[%s1172_s5] sm:$0xff]  ;;  %955 = vmatprep.subr.mxu1 %v1001_v7  ;;  %vm1002_vm2 = vmmov 0   ;;  %vm370_vm3 = vcmask 64512   ;;  %vm581_vm4 = vcmask 1040384  }
   0xd   : > { %946 = vmatpush3.bf16.msra.mxu0 %v303_v1  ;;  %s246_s28 = scalar_lea.vmem %s1167_s0, %s922_s25  ;;  %957 = vmatprep.mubr.msk.f32.mxu1 %vm1002_vm2, %v1001_v7  ;;  %vm577_vm5 = vcmask 7168   ;;  %vm822_vm6 = vcmask 60416   ;;  %s251_s15 = scalar_lea.vmem %s1173_s6, %s922_s25 }
   0xe   : > { %v987_v2 = vld [vmem:[%s246_s28] sm:$0xff]   ;;  %v988_v3 = vld [vmem:[%s246_s28 + $0x8] sm:$0xff]   ;;  %v989_v4 = vld [vmem:[%s246_s28 + $0x10] sm:$0xff]   ;;  %956 = vmatpush3.msra.mxu1 %v1060_v6 }
   0xf   : > { %947 = vmatprep.mubr.msk.bf16.mxu0 %vm288_vm1, %v987_v2  ;;  %v990_v5 = vld [vmem:[%s246_s28 + $0x18] sm:$0xff]   ;;  %960 = vmatprep.subr.mxu1 %v1001_v7  ;;  %v421_v2 = vld [vmem:[%s1171_s4] sm:$0x1] }
  0x10   : > { %948 = vmatmul.mubr.msk.bf16.vlgmr.msra.gmra.mxu0 %vm288_vm1, %v988_v3 }
  0x11   : > { %951 = vmatprep.mubr.msk.bf16.mxu0 %vm288_vm1, %v989_v4 }
  0x18   : > { %952 = vmatmul.mubr.msk.bf16.gmra.mxu0 %vm288_vm1, %v990_v5 }
  0xd0   : > { %v1067_v8 = vpop.f32.mrf.mxu0 }
  0xd1   : > { %v394_v13 = vmul.f32 %v1067_v8, %v1067_v8  ;;  %v374_v19 = vsel %vm370_vm3, %v1067_v8, 0.0 }
  0xd2   : > { %v1069_v9 = vpop.f32.mrf.mxu0 }
  0xd3   : > { %v392_v11 = vmul.f32 %v1069_v9, %v1069_v9  ;;  %v371_v14 = vsel %vm370_vm3, %v1069_v9, 0.0  ;;  %v403_v26 = vsel %vm370_vm3, %v394_v13, 0.0 }
  0xd4   : > { %v1071_v10 = vpop.f32.mrf.mxu0 }
  0xd5   : > { %v400_v20 = vsel %vm370_vm3, %v392_v11, 0.0  ;;  %v395_v21 = vmul.f32 %v1071_v10, %v1071_v10  ;;  %v376_v27 = vsel %vm370_vm3, %v1071_v10, 0.0 }
  0xd6   : > { %v1075_v12 = vpop.f32.mrf.mxu0 }
  0xd7   : > { %v372_v15 = vsel %vm370_vm3, %v1075_v12, 0.0  ;;  %v393_v16 = vmul.f32 %v1075_v12, %v1075_v12  ;;  %v405_v32 = vsel %vm370_vm3, %v395_v21, 0.0 }
  0xd8   : > { %v373_v17 = vadd.f32 %v372_v15, %v371_v14  ;;  %v1085_v18 = vpop.f32.mrf.mxu0 }
  0xd9   : > { %v401_v22 = vsel %vm370_vm3, %v393_v16, 0.0  ;;  %v398_v37 = vmul.f32 %v1085_v18, %v1085_v18  ;;  %v382_v43 = vsel %vm370_vm3, %v1085_v18, 0.0 }
  0xda   : > { %v375_v23 = vadd.f32 %v374_v19, %v373_v17  ;;  %v402_v24 = vadd.f32 %v401_v22, %v400_v20  ;;  %v1093_v25 = vpop.f32.mrf.mxu0  ;;  %v728_v22 = vlaneseq }
  0xdb   : > { %v396_v28 = vmul.f32 %v1093_v25, %v1093_v25  ;;  %v378_v33 = vsel %vm370_vm3, %v1093_v25, 0.0  ;;  %v411_v48 = vsel %vm370_vm3, %v398_v37, 0.0 }
  0xdc   : > { %v404_v29 = vadd.f32 %v403_v26, %v402_v24  ;;  %v377_v30 = vadd.f32 %v376_v27, %v375_v23  ;;  %v1100_v31 = vpop.f32.mrf.mxu0  ;;  %v729_v23 = vshrl.u32 %v728_v22, 7 }
  0xdd   : > { %v407_v38 = vsel %vm370_vm3, %v396_v28, 0.0  ;;  %v399_v44 = vmul.f32 %v1100_v31, %v1100_v31  ;;  %v384_v49 = vsel %vm370_vm3, %v1100_v31, 0.0 }
  0xde   : > { %v379_v34 = vadd.f32 %v378_v33, %v377_v30  ;;  %v406_v35 = vadd.f32 %v405_v32, %v404_v29  ;;  %v1105_v36 = vpop.f32.mrf.mxu0  ;;  %v730_v24 = vsub.s32 0, %v729_v23 }
  0xdf   : > { %v380_v39 = vsel %vm370_vm3, %v1105_v36, 0.0  ;;  %v397_v40 = vmul.f32 %v1105_v36, %v1105_v36  ;;  %v413_v52 = vsel %vm370_vm3, %v399_v44, 0.0 }
  0xe0   : > { %v408_v41 = vadd.f32 %v407_v38, %v406_v35  ;;  %v381_v42 = vadd.f32 %v380_v39, %v379_v34 }
  0xe1   : > { %v409_v45 = vsel %vm370_vm3, %v397_v40, 0.0 }
  0xe2   : > { %v383_v46 = vadd.f32 %v382_v43, %v381_v42  ;;  %v410_v47 = vadd.f32 %v409_v45, %v408_v41 }
  0xe4   : > { %v385_v50 = vadd.f32 %v384_v49, %v383_v46  ;;  %v412_v51 = vadd.f32 %v411_v48, %v410_v47 }
  0xe6   : > { %v386_v53 = vrot.slane %v385_v50, 4  ;;  %v414_v54 = vadd.f32 %v413_v52, %v412_v51 }
  0xe8   : > { %v387_v55 = vadd.f32 %v386_v53, %v385_v50  ;;  %v415_v56 = vrot.slane %v414_v54, 4 }
  0xea   : > { %v388_v57 = vrot.slane %v387_v55, 2  ;;  %v416_v58 = vadd.f32 %v415_v56, %v414_v54 }
  0xec   : > { %v417_v59 = vrot.slane %v416_v58, 2  ;;  %v389_v60 = vadd.f32 %v388_v57, %v387_v55 }
  0xee   : > { %v418_v61 = vadd.f32 %v417_v59, %v416_v58  ;;  %v390_v62 = vrot.slane %v389_v60, 1 }
  0xf0   : > { %v391_v63 = vadd.f32 %v390_v62, %v389_v60  ;;  %v419_v0 = vrot.slane %v418_v61, 1 }
  0xf2   : > { %958 = vmatmul.mubr.msk.f32.vlgmr.msra.gmra.mxu1 %vm370_vm3, %v391_v63  ;;  %v420_v1 = vadd.f32 %v419_v0, %v418_v61 }
  0xf3   : > { %961 = vmatpush3.msra.mxu1 %v1060_v6  ;;  %962 = vmatprep.mubr.msk.f32.mxu1 %vm1002_vm2, %v1001_v7 }
  0xf4   : > { %965 = vmatprep.subr.mxu1 %v1001_v7 }
  0xf6   : > { %963 = vmatmul.mubr.msk.f32.vlgmr.msra.gmra.mxu1 %vm370_vm3, %v420_v1 }
  0xf7   : > { %967 = vmatprep.mubr.msk.f32.mxu1 %vm1002_vm2, %v1001_v7  ;;  %966 = vmatpush3.msk.msra.mxu1 %vm581_vm4, %v421_v2 }
  0xf8   : > { %970 = vmatprep.subr.mxu1 %v1001_v7 }
 0x1b2   : > { %v492_v3 = vpop.f32.mrf.mxu1 }
 0x1b3   : > { %v570_v4 = vmul.f32 0.001953125, %v492_v3 }
 0x1b4   : > { %v959_v5 = vpop.f32.mrf.mxu1 }
 0x1b5   : > { %968 = vmatmul.mubr.msk.f32.vlgmr.msra.gmra.mxu1 %vm577_vm5, %v570_v4  ;;  %v572_v11 = vmul.f32 %v570_v4, %v570_v4 }
 0x1b6   : > { %v565_v6 = vpop.f32.mrf.mxu1  ;;  %971 = vmatpush3.msk.msra.mxu1 %vm581_vm4, %v421_v2  ;;  %972 = vmatprep.mubr.msk.f32.mxu1 %vm1002_vm2, %v1001_v7 }
 0x1b7   : > { %v571_v13 = vmul.f32 0.001953125, %v565_v6 }
 0x1b8   : > { %v964_v14 = vpop.f32.mrf.mxu1 }
 0x1b9   : > { %v573_v15 = vsub.f32 %v571_v13, %v572_v11 }
 0x1bb   : > { %v574_v16 = vmax.f32 %v573_v15, 0.0 }
 0x1bd   : > { %v575_v17 = vadd.f32 1e-05, %v574_v16 }
 0x1bf   : > { %991 = vrsqrt.f32 %v575_v17 }
 0x1cc   : > { %v992_v19 = vpop.eup %991 }
 0x1cd   : > { %973 = vmatmul.mubr.msk.f32.vlgmr.msra.gmra.mxu1 %vm577_vm5, %v992_v19 }
 0x275   : > { %v651_v20 = vpop.f32.mrf.mxu1 }
 0x276   : > { %v731_v26 = vrot.slane %v651_v20, %v730_v24 }
 0x277   : > { %v969_v21 = vpop.f32.mrf.mxu1 }
 0x278   : > { %v732_v27 = vsub.f32 %v1069_v9, %v731_v26  ;;  %v733_v7 = vsub.f32 %v1075_v12, %v731_v26  ;;  %v734_v29 = vsub.f32 %v1067_v8, %v731_v26  ;;  %v735_v30 = vsub.f32 %v1071_v10, %v731_v26  ;;  %v910_v9 = vld [vmem:[%s1169_s2] ss:$0 sm:$0xff] }
 0x279   : > { %v736_v33 = vsub.f32 %v1093_v25, %v731_v26  ;;  %v737_v34 = vsub.f32 %v1105_v36, %v731_v26  ;;  %v738_v35 = vsub.f32 %v1085_v18, %v731_v26  ;;  %v739_v37 = vsub.f32 %v1100_v31, %v731_v26  ;;  %v911_v18 = vld [vmem:[%s1170_s3] ss:$0 sm:$0xff] }
 0x28d   : > { %v724_v28 = vpop.f32.mrf.mxu1 }
 0x28e   : > { %v743_v32 = vrot.slane %v724_v28, %v730_v24 }
 0x28f   : > { %v974_v38 = vpop.f32.mrf.mxu1 }
 0x290   : > { %v744_v12 = vmul.f32 %v743_v32, %v732_v27  ;;  %v745_v39 = vmul.f32 %v743_v32, %v733_v7  ;;  %v746_v8 = vmul.f32 %v743_v32, %v734_v29  ;;  %v747_v40 = vmul.f32 %v743_v32, %v735_v30 }
 0x291   : > { %v748_v10 = vmul.f32 %v743_v32, %v736_v33  ;;  %v749_v41 = vmul.f32 %v743_v32, %v737_v34  ;;  %v750_v42 = vmul.f32 %v743_v32, %v738_v35  ;;  %v751_v25 = vmul.f32 %v743_v32, %v739_v37 }
 0x292   : > { %v759_v36 = vmul.f32 %v910_v9, %v744_v12  ;;  %v760_v31 = vmul.f32 %v910_v9, %v745_v39  ;;  %v761_v43 = vmul.f32 %v910_v9, %v746_v8  ;;  %v762_v44 = vmul.f32 %v910_v9, %v747_v40 }
 0x293   : > { %v763_v45 = vmul.f32 %v910_v9, %v748_v10  ;;  %v764_v46 = vmul.f32 %v910_v9, %v749_v41  ;;  %v765_v47 = vmul.f32 %v910_v9, %v750_v42  ;;  %v766_v48 = vmul.f32 %v910_v9, %v751_v25 }
 0x294   : > { %v774_v49 = vadd.f32 %v911_v18, %v759_v36  ;;  %v775_v50 = vadd.f32 %v911_v18, %v760_v31  ;;  %v776_v51 = vadd.f32 %v911_v18, %v761_v43  ;;  %v777_v52 = vadd.f32 %v911_v18, %v762_v44 }
 0x295   : > { %v778_v53 = vadd.f32 %v911_v18, %v763_v45  ;;  %v779_v54 = vadd.f32 %v911_v18, %v764_v46  ;;  %v780_v55 = vadd.f32 %v911_v18, %v765_v47  ;;  %v781_v56 = vadd.f32 %v911_v18, %v766_v48 }
 0x296   : > { %v782_v57 = vmax.f32 %v774_v49, 0.0  ;;  %v783_v58 = vmax.f32 %v775_v50, 0.0  ;;  %v784_v59 = vmax.f32 %v776_v51, 0.0  ;;  %v785_v60 = vmax.f32 %v777_v52, 0.0 }
 0x297   : > { %v786_v61 = vmax.f32 %v778_v53, 0.0  ;;  %v787_v62 = vmax.f32 %v779_v54, 0.0  ;;  %v788_v63 = vmax.f32 %v780_v55, 0.0  ;;  %v789_v0 = vmax.f32 %v781_v56, 0.0 }
 0x298   : > { %v924_v1 = vpack.c.bf16 %v782_v57, %v782_v57  ;;  %v925_v2 = vpack.c.bf16 %v783_v58, %v783_v58  ;;  %v926_v3 = vpack.c.bf16 %v784_v59, %v784_v59  ;;  %v927_v4 = vpack.c.bf16 %v785_v60, %v785_v60 }
 0x299   : > { %v928_v5 = vpack.c.bf16 %v786_v61, %v786_v61  ;;  %v929_v6 = vpack.c.bf16 %v787_v62, %v787_v62  ;;  %v930_v11 = vpack.c.bf16 %v788_v63, %v788_v63  ;;  %v931_v13 = vpack.c.bf16 %v789_v0, %v789_v0 }
 0x29a   : > { %823 = vst.msk [vmem:[%s251_s15] sm:$0xf] %vm822_vm6, %v924_v1  ;;  %824 = vst.msk [vmem:[%s251_s15 + $0x4] sm:$0xf] %vm822_vm6, %v925_v2 }
 0x29b   : > { %825 = vst.msk [vmem:[%s251_s15 + $0x8] sm:$0xf] %vm822_vm6, %v926_v3  ;;  %826 = vst.msk [vmem:[%s251_s15 + $0xc] sm:$0xf] %vm822_vm6, %v927_v4 }
 0x29c   : > { %827 = vst.msk [vmem:[%s251_s15 + $0x10] sm:$0xf] %vm822_vm6, %v928_v5  ;;  %828 = vst.msk [vmem:[%s251_s15 + $0x14] sm:$0xf] %vm822_vm6, %v929_v6 }
 0x29d   : > { %829 = vst.msk [vmem:[%s251_s15 + $0x18] sm:$0xf] %vm822_vm6, %v930_v11  ;;  %830 = vst.msk [vmem:[%s251_s15 + $0x1c] sm:$0xf] %vm822_vm6, %v931_v13 }
 0x29e PF: > { %s16_s21 = sadd.s32 1, %s999_s21  }
 0x29f   : > { %p13_p4 = scmp.ge.s32.totalorder %s16_s21, 4  }
 0x2a1   :  { %15 = sbr.rel (!%p13_p4) target bundleno = 1 (0x1), region = 74 }

</bundles_post_ra>
